<compile_context>
chip_gen: v7x
topology: tpu7x:2x2x1
jax: 0.10.0
libtpu: 0.0.40
codegen_flags: <defaults>
</compile_context>

<pallas_src>
import functools

import jax
import jax.numpy as jnp
from jax import lax
from jax.experimental import pallas as pl
from jax.experimental.pallas import tpu as pltpu


def _round_up(x, m):
    return -(-x // m) * m


def _segsum_lanes(v, period):
    """Sum lanes sharing the same (lane % period).

    v: (R, L*period) f32 with position-major lanes (lane j = l*period + nb).
    Returns (R, period) = sum_l v[:, l*period + nb].
    Pure contiguous lane slices + VPU adds (log2(L) folds) — no MXU, no reshape,
    no gather.
    """
    L = v.shape[-1] // period
    carry = None
    while L > 1:
        if L % 2 == 1:
            tail = v[:, (L - 1) * period:]
            carry = tail if carry is None else carry + tail
            v = v[:, :(L - 1) * period]
            L -= 1
        half = L // 2
        v = v[:, :half * period] + v[:, half * period:]
        L = half
    return v if carry is None else v + carry


def _lane_tile(v, reps):
    """Tile v (R, W) -> (R, W*reps) along lanes with log2(reps) concats."""
    if reps == 1:
        return v
    out = None
    chunk = v
    r = reps
    while r:
        if r & 1:
            out = chunk if out is None else jnp.concatenate([out, chunk], axis=-1)
        r >>= 1
        if r:
            chunk = jnp.concatenate([chunk, chunk], axis=-1)
    return out


def _down_kernel(xph_ref, w_ref, b_ref, out_ref, *,
                 K, stride, C_in, n_blk, L_out, eps, negative_slope):
    # xph_ref: (stride*C_in, P*n_blk) bf16 — phase-split padded input for this
    #          batch group; row r*C_in + c holds phase r, channel c; lane index
    #          is m*n_blk + nb (position-major).
    # w_ref:   (C_out_p, K*C_in) bf16 — fused conv weight (row-major over k,c).
    # b_ref:   (C_out_p, 1) f32 — conv bias.
    # out_ref: (C_out_p, L_out*n_blk) f32 — lane index j = l*n_blk + nb.
    Lb = L_out * n_blk

    # ---- Conv1d: ONE fused bf16 MXU matmul, contraction depth K*C_in. -------
    # Output lane j = l*n_blk + nb needs x[n, c, l*stride + k]; with k=q*stride+r
    # that is phase r, positions [q, q+L_out) -> a contiguous lane slice.
    taps = []
    for k in range(K):                                  # static unroll, K small
        q, r = divmod(k, stride)
        taps.append(xph_ref[r * C_in:(r + 1) * C_in, q * n_blk:q * n_blk + Lb])
    rhs = jnp.concatenate(taps, axis=0)                 # (K*C_in, Lb) bf16
    y = jnp.dot(w_ref[...], rhs, preferred_element_type=jnp.float32)
    y = y + b_ref[...]                                  # (C_out_p, Lb) f32

    # ---- InstanceNorm1d (affine=False): two-pass stats, entirely off-MXU. ---
    inv_L = 1.0 / L_out
    mean = _segsum_lanes(y, n_blk) * inv_L              # (C_out_p, n_blk)
    yc = y - _lane_tile(mean, L_out)                    # centered
    var = _segsum_lanes(yc * yc, n_blk) * inv_L         # (C_out_p, n_blk)
    inv_std = lax.rsqrt(var + eps)
    y_n = yc * _lane_tile(inv_std, L_out)

    # ---- LeakyReLU ----
    out_ref[...] = jnp.where(y_n >= 0, y_n, negative_slope * y_n).astype(out_ref.dtype)


def _vmem_capacity_bytes():
    """Physical VMEM of the attached TPU (fallback: 128 MiB = v5e/v6e)."""
    try:
        info = pltpu.get_tpu_info()
        for name in ("vmem_capacity_bytes", "vmem_size_bytes", "vmem_bytes"):
            cap = getattr(info, name, None)
            if cap:
                return int(cap)
    except Exception:
        pass
    return 128 << 20


def _pick_n_blk(N, C_in, C_out_p, K, stride, P, L_out, vmem_cap):
    """Largest divisor of N whose per-step VMEM footprint fits the budget.

    Footprint model: double-buffered input/output blocks + constant blocks +
    live in-kernel temporaries (concat conv operand and the f32 y/yc/tiles).
    Prefers n_blk with lane-aligned Lb = L_out*n_blk (multiple of 128).
    """
    budget = (3 * vmem_cap) // 8        # ~48 MiB on 128 MiB parts, ~24 MiB on v7x

    def fits(nb):
        pb = _round_up(P * nb, 128)
        lb = _round_up(L_out * nb, 128)
        in_blk = 2 * _round_up(stride * C_in, 16) * pb * 2           # bf16, 2 bufs
        out_blk = 2 * _round_up(C_out_p, 8) * lb * 4                 # f32, 2 bufs
        consts = 2 * (_round_up(C_out_p, 16) * _round_up(K * C_in, 128) * 2
                      + _round_up(C_out_p, 8) * 128 * 4)             # w2d + bias
        rhs = 2 * _round_up(K * C_in, 16) * lb * 2                   # taps + concat
        temps = 6 * _round_up(C_out_p, 8) * lb * 4                   # y/yc/tiles/out
        return in_blk + out_blk + consts + rhs + temps <= budget

    # On 64 MiB-per-core parts (v7x, 2 TensorCores) keep G = N // n_blk >= 2 so
    # the single "parallel" grid axis can be sharded across both cores.
    max_nb = N // 2 if (vmem_cap <= (64 << 20) and N >= 2) else N

    fitting = [d for d in range(1, max_nb + 1) if N % d == 0 and fits(d)]
    if not fitting:
        return 1
    aligned = [d for d in fitting if (L_out * d) % 128 == 0]
    return max(aligned) if aligned else max(fitting)


def down_forward(x, weight, bias, *, stride, padding,
                 eps=1e-5, negative_slope=0.01, n_blk=None):
    """x: (N, C_in, L) f32; weight: (C_out, C_in, K); bias: (C_out,)."""
    N, C_in, L = x.shape
    C_out, _, K = weight.shape
    L_pad = L + 2 * padding
    L_out = (L_pad - K) // stride + 1
    q_max = (K - 1) // stride
    P = L_out + q_max                  # phase length needed per batch element
    Lpp = P * stride

    C_out_p = _round_up(C_out, 8)      # f32 sublane padding for the output slab

    vmem_cap = _vmem_capacity_bytes()
    if n_blk is None:
        n_blk = _pick_n_blk(N, C_in, C_out_p, K, stride, P, L_out, vmem_cap)
    assert N % n_blk == 0, "n_blk must divide N"
    G = N // n_blk
    Lb = L_out * n_blk
    Pb = P * n_blk

    # ---- glue: bf16 cast FIRST (halves the repack bytes), pad, polyphase
    #            repack.  No gather, no K/stride data inflation. ----
    xb = x.astype(jnp.bfloat16)
    xb = jnp.pad(xb, ((0, 0), (0, 0),
                      (padding, padding + max(0, Lpp - L_pad))))
    if Lpp < L_pad:
        xb = xb[:, :, :Lpp]
    # xph[g, r*C_in + c, m*n_blk + nb] = x_padded[g*n_blk + nb, c, m*stride + r]
    xph = (xb.reshape(G, n_blk, C_in, P, stride)
             .transpose(0, 4, 2, 3, 1)
             .reshape(G, stride * C_in, Pb))

    # Fused conv weight: w2d[o, k*C_in + c] = weight[o, c, k]
    w2d = jnp.transpose(weight, (0, 2, 1)).reshape(C_out, K * C_in).astype(jnp.bfloat16)
    b2d = bias.astype(jnp.float32).reshape(C_out, 1)
    if C_out_p > C_out:
        w2d = jnp.pad(w2d, ((0, C_out_p - C_out), (0, 0)))
        b2d = jnp.pad(b2d, ((0, C_out_p - C_out), (0, 0)))

    kernel = functools.partial(_down_kernel, K=K, stride=stride, C_in=C_in,
                               n_blk=n_blk, L_out=L_out, eps=eps,
                               negative_slope=negative_slope)

    # NOTE: w2d / b2d are constant-index blocks; the big constant the review
    # flagged (seg) is gone, and these are KiB-scale, so the default double
    # buffering costs nothing worth a pipeline_mode override.
    yg = pl.pallas_call(
        kernel,
        out_shape=jax.ShapeDtypeStruct((G, C_out_p, Lb), jnp.float32),
        grid_spec=pltpu.PrefetchScalarGridSpec(
            num_scalar_prefetch=0,
            grid=(G,),
            in_specs=[
                pl.BlockSpec((pl.Squeezed(), stride * C_in, Pb),
                             lambda g: (g, 0, 0)),
                pl.BlockSpec((C_out_p, K * C_in), lambda g: (0, 0)),
                pl.BlockSpec((C_out_p, 1), lambda g: (0, 0)),
            ],
            out_specs=pl.BlockSpec((pl.Squeezed(), C_out_p, Lb),
                                   lambda g: (g, 0, 0)),
        ),
        compiler_params=pltpu.CompilerParams(
            dimension_semantics=("parallel",),
            vmem_limit_bytes=int(min(vmem_cap // 2, 96 << 20))),
    )(xph, w2d, b2d)

    # (G, C_out_p, L_out, n_blk) -> (N, C_out, L_out): one layout pass over the
    # output; inherent to folding batch into the lane axis (see header note).
    out = (yg.reshape(G, C_out_p, L_out, n_blk)
             .transpose(0, 3, 1, 2)
             .reshape(N, C_out_p, L_out)[:, :C_out]
             .astype(x.dtype))
    return out


def _reference(x, weight, bias, *, stride, padding, eps=1e-5,
               negative_slope=0.01, matmul_dtype=jnp.float32):
    # matmul_dtype=bfloat16 rounds the conv operands exactly like the kernel's
    # MXU inputs (accumulation stays f32 in both).
    xc = x.astype(matmul_dtype).astype(jnp.float32)
    wc = weight.astype(matmul_dtype).astype(jnp.float32)
    y = lax.conv_general_dilated(
        xc, wc, window_strides=(stride,), padding=[(padding, padding)],
        dimension_numbers=("NCH", "OIH", "NCH"),
        precision=lax.Precision.HIGHEST)
    y = y + bias[None, :, None]
    mean = jnp.mean(y, axis=-1, keepdims=True)
    var = jnp.mean((y - mean) ** 2, axis=-1, keepdims=True)
    y = (y - mean) * lax.rsqrt(var + eps)
    return jnp.where(y >= 0, y, negative_slope * y)


if __name__ == "__main__":
    # Small shapes consistent with the module's forward:
    # batch=2, in_channel=4, out_channel=8, kernel=4, stride=2, padding=1, L=16
    N, C_in, C_out, K, STRIDE, PAD, L = 2, 4, 8, 4, 2, 1, 16

    key = jax.random.PRNGKey(0)
    kx, kw, kb = jax.random.split(key, 3)
    x = jax.random.normal(kx, (N, C_in, L), dtype=jnp.float32)
    bound = 1.0 / (C_in * K) ** 0.5
    weight = jax.random.uniform(kw, (C_out, C_in, K), jnp.float32, -bound, bound)
    bias = jax.random.uniform(kb, (C_out,), jnp.float32, -bound, bound)

    out = down_forward(x, weight, bias, stride=STRIDE, padding=PAD)
    out = jax.block_until_ready(out)

    L_OUT = (L + 2 * PAD - K) // STRIDE + 1
    assert out.shape == (N, C_out, L_OUT)

    # Tight check vs. a reference whose conv operands are rounded to bf16 like
    # the kernel's MXU operands.
    ref_bf16 = _reference(x, weight, bias, stride=STRIDE, padding=PAD,
                          matmul_dtype=jnp.bfloat16)
    assert jnp.allclose(out, ref_bf16, atol=2e-4, rtol=2e-4), \
        float(jnp.max(jnp.abs(out - ref_bf16)))

    # Loose sanity check vs. the full-f32 reference (bf16 operand rounding only).
    ref_f32 = _reference(x, weight, bias, stride=STRIDE, padding=PAD)
    assert jnp.allclose(out, ref_f32, atol=5e-2, rtol=2e-2), \
        float(jnp.max(jnp.abs(out - ref_f32)))

    print("KERNEL_OK")
</pallas_src>

<mosaic_0001>
module attributes {stable_mosaic.version = 11 : i64} {
  func.func @_down_kernel(%arg0: i32, %arg1: memref<1x8x18xbf16, #tpu.memory_space<vmem>>, %arg2: memref<8x16xbf16, #tpu.memory_space<vmem>>, %arg3: memref<8x1xf32, #tpu.memory_space<vmem>>, %arg4: memref<1x8x16xf32, #tpu.memory_space<vmem>>) attributes {dimension_semantics = [#tpu.dimension_semantics<parallel>], iteration_bounds = array<i64: 1>, scalar_prefetch = 0 : i64, scratch_operands = 0 : i64, tpu.core_type = #tpu.core_type<tc>, window_params = [{transform_indices = @transform_0, window_bounds = array<i64: 1, 8, 18>}, {pipeline_mode = #tpu.pipeline_mode<synchronous>, transform_indices = @transform_1, window_bounds = array<i64: 8, 16>}, {pipeline_mode = #tpu.pipeline_mode<synchronous>, transform_indices = @transform_2, window_bounds = array<i64: 8, 1>}, {transform_indices = @transform_3, window_bounds = array<i64: 1, 8, 16>}]} {
    %c0 = arith.constant 0 : index
    %c0_0 = arith.constant 0 : index
    %c0_1 = arith.constant 0 : index
    %0 = vector.load %arg1[%c0, %c0_0, %c0_1] : memref<1x8x18xbf16, #tpu.memory_space<vmem>>, vector<1x4x16xbf16>
    %1 = vector.shape_cast %0 : vector<1x4x16xbf16> to vector<4x16xbf16>
    %c0_2 = arith.constant 0 : index
    %c4 = arith.constant 4 : index
    %c0_3 = arith.constant 0 : index
    %2 = vector.load %arg1[%c0_2, %c4, %c0_3] : memref<1x8x18xbf16, #tpu.memory_space<vmem>>, vector<1x4x16xbf16>
    %3 = vector.shape_cast %2 : vector<1x4x16xbf16> to vector<4x16xbf16>
    %c0_4 = arith.constant 0 : index
    %c0_5 = arith.constant 0 : index
    %c2 = arith.constant 2 : index
    %4 = vector.load %arg1[%c0_4, %c0_5, %c2] : memref<1x8x18xbf16, #tpu.memory_space<vmem>>, vector<1x4x16xbf16>
    %5 = vector.shape_cast %4 : vector<1x4x16xbf16> to vector<4x16xbf16>
    %c0_6 = arith.constant 0 : index
    %c4_7 = arith.constant 4 : index
    %c2_8 = arith.constant 2 : index
    %6 = vector.load %arg1[%c0_6, %c4_7, %c2_8] : memref<1x8x18xbf16, #tpu.memory_space<vmem>>, vector<1x4x16xbf16>
    %7 = vector.shape_cast %6 : vector<1x4x16xbf16> to vector<4x16xbf16>
    %8 = tpu.concatenate %1, %3, %5, %7 in 0 : vector<4x16xbf16>, vector<4x16xbf16>, vector<4x16xbf16>, vector<4x16xbf16> -> vector<16x16xbf16>
    %c0_9 = arith.constant 0 : index
    %c0_10 = arith.constant 0 : index
    %9 = vector.load %arg2[%c0_9, %c0_10] : memref<8x16xbf16, #tpu.memory_space<vmem>>, vector<8x16xbf16>
    %cst = arith.constant dense<0.000000e+00> : vector<8x16xf32>
    %10 = tpu.matmul %9, %8, %cst {dimension_numbers = #tpu.dot_dimension_numbers<[1], [0], [0], [1], [0, 0, 1, 1], [], []>} : vector<8x16xbf16>, vector<16x16xbf16>, vector<8x16xf32> -> vector<8x16xf32>
    %c0_11 = arith.constant 0 : index
    %c0_12 = arith.constant 0 : index
    %11 = vector.load %arg3[%c0_11, %c0_12] : memref<8x1xf32, #tpu.memory_space<vmem>>, vector<8x1xf32>
    %12 = vector.broadcast %11 : vector<8x1xf32> to vector<8x16xf32>
    %13 = arith.addf %10, %12 : vector<8x16xf32>
    %14 = vector.extract_strided_slice %13 {offsets = [0, 0], sizes = [8, 8], strides = [1, 1]} : vector<8x16xf32> to vector<8x8xf32>
    %15 = vector.extract_strided_slice %13 {offsets = [0, 8], sizes = [8, 8], strides = [1, 1]} : vector<8x16xf32> to vector<8x8xf32>
    %16 = arith.addf %14, %15 : vector<8x8xf32>
    %17 = vector.extract_strided_slice %16 {offsets = [0, 0], sizes = [8, 4], strides = [1, 1]} : vector<8x8xf32> to vector<8x4xf32>
    %18 = vector.extract_strided_slice %16 {offsets = [0, 4], sizes = [8, 4], strides = [1, 1]} : vector<8x8xf32> to vector<8x4xf32>
    %19 = arith.addf %17, %18 : vector<8x4xf32>
    %20 = vector.extract_strided_slice %19 {offsets = [0, 0], sizes = [8, 2], strides = [1, 1]} : vector<8x4xf32> to vector<8x2xf32>
    %21 = vector.extract_strided_slice %19 {offsets = [0, 2], sizes = [8, 2], strides = [1, 1]} : vector<8x4xf32> to vector<8x2xf32>
    %22 = arith.addf %20, %21 : vector<8x2xf32>
    %cst_13 = arith.constant 1.250000e-01 : f32
    %23 = vector.broadcast %cst_13 : f32 to vector<8x2xf32>
    %24 = arith.mulf %22, %23 : vector<8x2xf32>
    %25 = tpu.concatenate %24, %24 in 1 : vector<8x2xf32>, vector<8x2xf32> -> vector<8x4xf32>
    %26 = tpu.concatenate %25, %25 in 1 : vector<8x4xf32>, vector<8x4xf32> -> vector<8x8xf32>
    %27 = tpu.concatenate %26, %26 in 1 : vector<8x8xf32>, vector<8x8xf32> -> vector<8x16xf32>
    %28 = arith.subf %13, %27 : vector<8x16xf32>
    %29 = arith.mulf %28, %28 : vector<8x16xf32>
    %30 = vector.extract_strided_slice %29 {offsets = [0, 0], sizes = [8, 8], strides = [1, 1]} : vector<8x16xf32> to vector<8x8xf32>
    %31 = vector.extract_strided_slice %29 {offsets = [0, 8], sizes = [8, 8], strides = [1, 1]} : vector<8x16xf32> to vector<8x8xf32>
    %32 = arith.addf %30, %31 : vector<8x8xf32>
    %33 = vector.extract_strided_slice %32 {offsets = [0, 0], sizes = [8, 4], strides = [1, 1]} : vector<8x8xf32> to vector<8x4xf32>
    %34 = vector.extract_strided_slice %32 {offsets = [0, 4], sizes = [8, 4], strides = [1, 1]} : vector<8x8xf32> to vector<8x4xf32>
    %35 = arith.addf %33, %34 : vector<8x4xf32>
    %36 = vector.extract_strided_slice %35 {offsets = [0, 0], sizes = [8, 2], strides = [1, 1]} : vector<8x4xf32> to vector<8x2xf32>
    %37 = vector.extract_strided_slice %35 {offsets = [0, 2], sizes = [8, 2], strides = [1, 1]} : vector<8x4xf32> to vector<8x2xf32>
    %38 = arith.addf %36, %37 : vector<8x2xf32>
    %cst_14 = arith.constant 1.250000e-01 : f32
    %39 = vector.broadcast %cst_14 : f32 to vector<8x2xf32>
    %40 = arith.mulf %38, %39 : vector<8x2xf32>
    %cst_15 = arith.constant 9.99999974E-6 : f32
    %41 = vector.broadcast %cst_15 : f32 to vector<8x2xf32>
    %42 = arith.addf %40, %41 : vector<8x2xf32>
    %43 = math.rsqrt %42 : vector<8x2xf32>
    %44 = tpu.concatenate %43, %43 in 1 : vector<8x2xf32>, vector<8x2xf32> -> vector<8x4xf32>
    %45 = tpu.concatenate %44, %44 in 1 : vector<8x4xf32>, vector<8x4xf32> -> vector<8x8xf32>
    %46 = tpu.concatenate %45, %45 in 1 : vector<8x8xf32>, vector<8x8xf32> -> vector<8x16xf32>
    %47 = arith.mulf %28, %46 : vector<8x16xf32>
    %cst_16 = arith.constant 0.000000e+00 : f32
    %48 = vector.broadcast %cst_16 : f32 to vector<8x16xf32>
    %49 = arith.cmpf oge, %47, %48 : vector<8x16xf32>
    %cst_17 = arith.constant 0.00999999977 : f32
    %50 = vector.broadcast %cst_17 : f32 to vector<8x16xf32>
    %51 = arith.mulf %50, %47 : vector<8x16xf32>
    %52 = arith.select %49, %47, %51 : vector<8x16xi1>, vector<8x16xf32>
    %c0_18 = arith.constant 0 : index
    %c0_19 = arith.constant 0 : index
    %c0_20 = arith.constant 0 : index
    %53 = vector.load %arg4[%c0_18, %c0_19, %c0_20] : memref<1x8x16xf32, #tpu.memory_space<vmem>>, vector<1x8x16xf32>
    %54 = vector.shape_cast %53 : vector<1x8x16xf32> to vector<8x16xf32>
    %55 = vector.shape_cast %52 : vector<8x16xf32> to vector<1x8x16xf32>
    tpu.vector_store %arg4[%c0_18, %c0_19, %c0_20], %55 {strides = array<i32>} : memref<1x8x16xf32, #tpu.memory_space<vmem>>, vector<1x8x16xf32>,
    return
  }
  func.func @transform_0(%arg0: i32) -> (i32, i32, i32) {
    %c0_i32 = arith.constant 0 : i32
    %c0_i32_0 = arith.constant 0 : i32
    %c0_i32_1 = arith.constant 0 : i32
    return %arg0, %c0_i32, %c0_i32_0 : i32, i32, i32
  }
  func.func @transform_1(%arg0: i32) -> (i32, i32) {
    %c0_i32 = arith.constant 0 : i32
    %c0_i32_0 = arith.constant 0 : i32
    %c0_i32_1 = arith.constant 0 : i32
    return %c0_i32, %c0_i32_0 : i32, i32
  }
  func.func @transform_2(%arg0: i32) -> (i32, i32) {
    %c0_i32 = arith.constant 0 : i32
    %c0_i32_0 = arith.constant 0 : i32
    %c0_i32_1 = arith.constant 0 : i32
    return %c0_i32, %c0_i32_0 : i32, i32
  }
  func.func @transform_3(%arg0: i32) -> (i32, i32, i32) {
    %c0_i32 = arith.constant 0 : i32
    %c0_i32_0 = arith.constant 0 : i32
    %c0_i32_1 = arith.constant 0 : i32
    return %arg0, %c0_i32, %c0_i32_0 : i32, i32, i32
  }
}

</mosaic_0001>

<bundles_post_ra>
// kernel: tpu_custom_call.1
= control target key start
LH: loop header
LB: loop body
LE: loop exit
PB: predicated region body
PF: predicated region fallthrough
CT: control target
= control target key end

     0   :  { %8 = vsyncpa [#allocation3], 0  ;;  %s432_s0 = inlined_call_operand.hbm [shape: bf16[1,8,18], index: 0, kind: input, shape index: {}]   ;;  %s433_s1 = inlined_call_operand.hbm [shape: bf16[8,16], index: 1, kind: input, shape index: {}]   ;;  %s434_s2 = inlined_call_operand.hbm [shape: f32[8,1], index: 2, kind: input, shape index: {}]   ;;  %s435_s3 = inlined_call_operand.hbm [shape: f32[1,8,16], index: 3, kind: output, shape index: {}]  }
   0x1   :  { %9 = vsyncpa [#allocation6], 0 }
   0x2   :  { %10 = vsyncpa [#allocation4], 0  ;;  %s339_s12 = smov [#allocation5]   ;;  %s340_s14 = smov [#allocation2]  }
   0x3   :  { %s27_s13 = sshll.u32 %s339_s12, 4  ;;  %s17_s15 = sshll.u32 %s340_s14, 4  ;;  %s28_s13 = int_to_ptr.vmem [resolvable:$true] %s27_s13  ;;  %s18_s15 = int_to_ptr.vmem [resolvable:$true] %s17_s15 }
   0x4   :  { %s245_s18 = scalar_lea.hbm %s433_s1, 64 }
   0x5   :  { %p246_p0 = scmp.ne.s32.totalorder %s433_s1, %s245_s18  ;;  %p249_p1 = scmp.lt.u32.totalorder %s245_s18, %s433_s1 }
   0x7   :  { %p251_p2 = pnand %p249_p1, %p246_p0 }
   0x9   :  { %254 = shalt.err (!%p251_p2)
}
   0xa   :  { %s255_s23 = scalar_lea.vmem %s28_s13, 64  ;;  %p260_p4 = scmp.lt.s32.totalorder %s28_s13, %s28_s13 }
   0xb   :  { %p256_p3 = scmp.ne.s32.totalorder %s28_s13, %s255_s23  ;;  %p261_p5 = scmp.lt.s32.totalorder %s255_s23, %s255_s23 }
   0xd   :  { %p262_p6 = por %p261_p5, %p260_p4 }
   0xf   :  { %p263_p7 = pnand %p262_p6, %p256_p3 }
  0x11   :  { %266 = shalt.err (!%p263_p7)
}
  0x12   :  { %30 = dma.hbm_to_vmem [thread:$0]  %s433_s1, 64, %s28_s13, [#allocation6]  }
  0x13   :  { %s267_s28 = scalar_lea.hbm %s432_s0, 64 }
  0x14   :  { %p268_p8 = scmp.ne.s32.totalorder %s432_s0, %s267_s28  ;;  %p271_p9 = scmp.lt.u32.totalorder %s267_s28, %s432_s0 }
  0x16   :  { %p273_p10 = pnand %p271_p9, %p268_p8 }
  0x18   :  { %276 = shalt.err (!%p273_p10)
}
  0x19   :  { %s277_s6 = scalar_lea.vmem %s18_s15, 64  ;;  %p282_p12 = scmp.lt.s32.totalorder %s18_s15, %s18_s15 }
  0x1a   :  { %p278_p11 = scmp.ne.s32.totalorder %s18_s15, %s277_s6  ;;  %p283_p13 = scmp.lt.s32.totalorder %s277_s6, %s277_s6 }
  0x1c   :  { %p284_p0 = por %p283_p13, %p282_p12 }
  0x1e   :  { %p285_p1 = pnand %p284_p0, %p278_p11 }
  0x20   :  { %288 = shalt.err (!%p285_p1)
}
  0x21   :  { %20 = dma.hbm_to_vmem [thread:$0]  %s432_s0, 64, %s18_s15, [#allocation3]  }
  0x22   :  { %s341_s8 = smov [#allocation7]   ;;  %s289_s12 = scalar_lea.hbm %s434_s2, 128 }
  0x23   :  { %s37_s9 = sshll.u32 %s341_s8, 4  ;;  %p290_p2 = scmp.ne.s32.totalorder %s434_s2, %s289_s12  ;;  %s38_s9 = int_to_ptr.vmem [resolvable:$true] %s37_s9 }
  0x24   :  { %p293_p3 = scmp.lt.u32.totalorder %s289_s12, %s434_s2 }
  0x26   :  { %p295_p4 = pnand %p293_p3, %p290_p2 }
  0x28   :  { %298 = shalt.err (!%p295_p4)
}
  0x29   :  { %s299_s18 = scalar_lea.vmem %s38_s9, 128  ;;  %p304_p6 = scmp.lt.s32.totalorder %s38_s9, %s38_s9 }
  0x2a   :  { %p300_p5 = scmp.ne.s32.totalorder %s38_s9, %s299_s18  ;;  %p305_p7 = scmp.lt.s32.totalorder %s299_s18, %s299_s18 }
  0x2c   :  { %p306_p8 = por %p305_p7, %p304_p6 }
  0x2e   :  { %p307_p9 = pnand %p306_p8, %p300_p5 }
  0x30   :  { %310 = shalt.err (!%p307_p9)
}
  0x31   :  { %40 = dma.hbm_to_vmem [thread:$0]  %s434_s2, 128, %s38_s9, [#allocation6]  }
  0x32   :  { %333 = dma.done.wait [#allocation3], 64  }
  0x33   :  { %334 = vsyncadd [#allocation3], 4294967232 }
  0x34   :  { %335 = dma.done.wait [#allocation6], 192  }
  0x35   :  { %336 = vsyncadd [#allocation6], 4294967104  ;;  %v342_v0 = vmov 0.0   ;;  %vm343_vm0 = vmmov 0   ;;  %vm63_vm1 = vcmask 1041408   ;;  %v344_v1 = vmov 0  }
  0x36   :  { %220 = vmatprep.subr.bf16.mxu0 %v342_v0  ;;  %222 = vmatprep.mubr.msk.bf16.mxu0 %vm343_vm0, %v342_v0  ;;  %v51_v2 = vld [vmem:[#allocation2] sm:$0x3]  ;;  %v52_v3 = vld [vmem:[#allocation2] sm:$0xc]  ;;  %v75_v6 = vld [vmem:[#allocation7] sm:$0xff]  ;;  %s345_s19 = smov 126  }
  0x37   :  { %239 = vset.pattern.permute.xlu1 %v344_v1  ;;  %240 = vset.pattern.permute.xlu0 %v344_v1  ;;  %v215_v4 = vcombine.low %v51_v2, %v51_v2  ;;  %v66_v5 = vsel %vm63_vm1, %v51_v2, %v52_v3  ;;  %v216_v7 = vcombine.low %v52_v3, %v52_v3  ;;  %vm67_vm2 = vcmask 1043456   ;;  %v74_v12 = vld [vmem:[#allocation5] sm:$0xf]  ;;  %s346_s2 = smov 120   ;;  %s347_s20 = smov 124  }
  0x38   :  { %78 = vperm.xlu1 %239, %v75_v6   ;;  %vm70_vm3 = vcmask 1045504   ;;  %vm81_vm4 = vcmask 130048   ;;  %s348_s21 = smov 2   ;;  %vm145_vm5 = vcmask 15360   ;;  %s349_s22 = smov 4   ;;  %vm151_vm6 = vcmask 31744  }
  0x39   :  { %56 = vrot.lane.b32.xlu0 %v215_v4, %s345_s19  ;;  %s350_s23 = smov 8   ;;  %vm157_vm7 = vcmask 64512   ;;  %s351_s24 = smov [#allocation8]  }
  0x3a   :  { %s205_s25 = sshll.u32 %s351_s24, 4  ;;  %s206_s25 = int_to_ptr.vmem [resolvable:$true] %s205_s25 }
  0x3b   :  { %s311_s26 = scalar_lea.vmem %s206_s25, 128  ;;  %p316_p11 = scmp.lt.s32.totalorder %s206_s25, %s206_s25 }
  0x3c   :  { %p312_p10 = scmp.ne.s32.totalorder %s206_s25, %s311_s26  ;;  %p317_p12 = scmp.lt.s32.totalorder %s311_s26, %s311_s26 }
  0x3d   :  { %61 = vrot.lane.b32.xlu0 %v216_v7, %s345_s19 }
  0x3e   :  { %p318_p13 = por %p317_p12, %p316_p11 }
  0x40   :  { %p319_p0 = pnand %p318_p13, %p312_p10 }
  0xab   :  { %v57_v8 = vpop.permute.xlu0 %56 }
  0xac   :  { %v69_v9 = vsel %vm67_vm2, %v66_v5, %v57_v8 }
  0xaf   :  { %v62_v10 = vpop.permute.xlu0 %61 }
  0xb0   :  { %v72_v11 = vsel %vm70_vm3, %v69_v9, %v62_v10 }
  0xb1   :  { %221 = vmatpush3.bf16.msra.mxu0 %v72_v11 }
  0xb4   :  { %223 = vmatmul.mubr.msk.bf16.vlgmr.msra.gmra.mrb[0].mxu0 %vm81_vm4, %v74_v12 }
  0xb7   :  { %v79_v13 = vpop.permute.xlu1 %78 }
 0x187   :  { %v119_v14 = vpop.f32.mrb[0].mxu0 }
 0x188   :  { %v120_v15 = vadd.f32 %v119_v14, %v79_v13  ;;  %v224_v16 = vpop.f32.mrb[1].mxu0 }
 0x189   :  { %v122_v17 = vpop.f32.mrb[2].mxu0 }
 0x18a   :  { %126 = vrot.lane.b32.xlu1 %v120_v15, %s346_s2  ;;  %v225_v18 = vpop.f32.mrb[3].mxu0 }
 0x1fc   :  { %v127_v19 = vpop.permute.xlu1 %126 }
 0x1fd   :  { %v129_v20 = vadd.f32 %v127_v19, %v120_v15 }
 0x1ff   :  { %131 = vrot.lane.b32.xlu0 %v129_v20, %s347_s20 }
 0x271   :  { %v132_v21 = vpop.permute.xlu0 %131 }
 0x272   :  { %v134_v22 = vadd.f32 %v132_v21, %v129_v20 }
 0x274   :  { %136 = vrot.lane.b32.xlu1 %v134_v22, %s345_s19 }
 0x2e6   :  { %v137_v23 = vpop.permute.xlu1 %136 }
 0x2e7   :  { %v139_v24 = vadd.f32 %v137_v23, %v134_v22 }
 0x2e9   :  { %v140_v25 = vmul.f32 0.125, %v139_v24 }
 0x2eb   :  { %142 = vrot.lane.b32.xlu0 %v140_v25, %s348_s21 }
 0x35d   :  { %v143_v26 = vpop.permute.xlu0 %142 }
 0x35e   :  { %v146_v27 = vsel %vm145_vm5, %v140_v25, %v143_v26 }
 0x35f   :  { %148 = vrot.lane.b32.xlu1 %v146_v27, %s349_s22 }
 0x3d1   :  { %v149_v28 = vpop.permute.xlu1 %148 }
 0x3d2   :  { %v152_v29 = vsel %vm151_vm6, %v146_v27, %v149_v28 }
 0x3d3   :  { %154 = vrot.lane.b32.xlu0 %v152_v29, %s350_s23 }
 0x445   :  { %v155_v30 = vpop.permute.xlu0 %154 }
 0x446   :  { %v158_v31 = vsel %vm157_vm7, %v152_v29, %v155_v30 }
 0x447   :  { %v159_v32 = vsub.f32 %v120_v15, %v158_v31 }
 0x449   :  { %v160_v33 = vmul.f32 %v159_v32, %v159_v32 }
 0x44b   :  { %162 = vrot.lane.b32.xlu1 %v160_v33, %s346_s2 }
 0x4bd   :  { %v163_v34 = vpop.permute.xlu1 %162 }
 0x4be   :  { %v165_v35 = vadd.f32 %v163_v34, %v160_v33 }
 0x4c0   :  { %167 = vrot.lane.b32.xlu0 %v165_v35, %s347_s20 }
 0x532   :  { %v168_v36 = vpop.permute.xlu0 %167 }
 0x533   :  { %v170_v37 = vadd.f32 %v168_v36, %v165_v35 }
 0x535   :  { %172 = vrot.lane.b32.xlu1 %v170_v37, %s345_s19 }
 0x5a7   :  { %v173_v38 = vpop.permute.xlu1 %172 }
 0x5a8   :  { %v175_v39 = vadd.f32 %v173_v38, %v170_v37 }
 0x5aa   :  { %v176_v40 = vmul.f32 0.125, %v175_v39 }
 0x5ac   :  { %v177_v41 = vadd.f32 1e-05, %v176_v40 }
 0x5ae   :  { %243 = vrsqrt.f32 %v177_v41 }
 0x5b8   :  { %v244_v42 = vpop.eup %243 }
 0x5b9   :  { %180 = vrot.lane.b32.xlu0 %v244_v42, %s348_s21 }
 0x62b   :  { %v181_v43 = vpop.permute.xlu0 %180 }
 0x62c   :  { %v183_v44 = vsel %vm145_vm5, %v244_v42, %v181_v43 }
 0x62d   :  { %185 = vrot.lane.b32.xlu1 %v183_v44, %s349_s22 }
 0x69f   :  { %v186_v45 = vpop.permute.xlu1 %185 }
 0x6a0   :  { %v188_v46 = vsel %vm151_vm6, %v183_v44, %v186_v45 }
 0x6a1   :  { %190 = vrot.lane.b32.xlu0 %v188_v46, %s350_s23 }
 0x713   :  { %v191_v47 = vpop.permute.xlu0 %190 }
 0x714   :  { %v193_v48 = vsel %vm157_vm7, %v188_v46, %v191_v47 }
 0x715   :  { %v194_v49 = vmul.f32 %v193_v48, %v159_v32 }
 0x717   :  { %v196_v50 = vmul.f32 0.01, %v194_v49  ;;  %vm195_vm8 = vcmp.ge.f32.partialorder %v194_v49, 0.0 }
 0x719   :  { %v197_v51 = vsel %vm195_vm8, %v194_v49, %v196_v50 }
 0x71a   :  { %198 = vst.msk [vmem:[#allocation8] sm:$0xff] %vm81_vm4, %v197_v51 }
 0x71b   :  { %322 = shalt.err (!%p319_p0)
}
 0x71c   :  { %s323_s29 = scalar_lea.hbm %s435_s3, 128 }
 0x71d   :  { %p324_p1 = scmp.ne.s32.totalorder %s435_s3, %s323_s29  ;;  %p327_p2 = scmp.lt.u32.totalorder %s323_s29, %s435_s3 }
 0x71f   :  { %p329_p3 = pnand %p327_p2, %p324_p1 }
 0x721   :  { %332 = shalt.err (!%p329_p3)
}
 0x722   :  { %208 = dma.vmem_to_hbm [thread:$0]  %s206_s25, 128, %s435_s3, [#allocation4]  }
 0x723   :  { %337 = dma.done.wait [#allocation4], 128  }
 0x724   :  { %338 = vsyncadd [#allocation4], 4294967168 }
 0x725   :  { %212 = vsyncpa [#allocation3], 1 }
 0x726   :  { %213 = vsyncpa [#allocation6], 1 }
 0x727   :  { %214 = vsyncpa [#allocation4], 1 }

</bundles_post_ra>
